<compile_context>
chip_gen: v7x
topology: tpu7x:2x2x1
jax: 0.10.0
libtpu: 0.0.40
codegen_flags: <defaults>
</compile_context>

<pallas_src>
import functools
import math

import jax
import jax.numpy as jnp
from jax.experimental import pallas as pl
from jax.experimental.pallas import tpu as pltpu


def _focal_kernel(x_ref, t_ref, bw_ref, o_ref, *, gamma):
    # Cast inside the kernel so non-f32 inputs do not need a wrapper astype
    # (which would be an extra full HBM pass in XLA).
    x = x_ref[...].astype(jnp.float32)       # (rows, L) logits
    t = t_ref[...].astype(jnp.float32)       # (rows, L) targets in {-1, 0, 1}
    bw = bw_ref[...].astype(jnp.float32)     # (1, L) tiled balance weights

    # Shared transcendentals.
    e = jnp.exp(-jnp.abs(x))                 # exp(-|x|)
    lp = jnp.log1p(e)                        # log(1 + exp(-|x|))
    log_sig_pos = jnp.minimum(x, 0.0) - lp   # logsigmoid(x), stable
    log_sig_neg = log_sig_pos - x            # logsigmoid(-x) = logsigmoid(x) - x

    # sigmoid(x) = where(x >= 0, 1, e) / (1 + e), reusing the same exp.
    # (exact division kept for accuracy; pl.reciprocal(approx=True) is an
    #  option if looser tolerance is acceptable)
    probs = jnp.where(x >= 0.0, 1.0, e) / (1.0 + e)

    bce = -(t * log_sig_pos) * bw - (1.0 - t) * log_sig_neg

    # gamma is a static Python float -> specialize at trace time.
    if gamma == 0.0:
        cls_loss = bce                       # pow(., 0) == 1, skip entirely
    else:
        fw_base = jnp.where(t == 1.0, 1.0 - probs, probs)
        if float(gamma).is_integer() and 0 < gamma <= 8:
            fw = fw_base
            for _ in range(int(gamma) - 1):
                fw = fw * fw_base            # repeated multiply, no exp/log
            focal_weight = fw
        else:
            focal_weight = jnp.power(fw_base, gamma)
        cls_loss = focal_weight * bce

    # Zero ignored targets (-1) and tiny losses (< 1e-5), as in PyTorch.
    cls_loss = jnp.where(t != -1.0, cls_loss, 0.0)
    cls_loss = jnp.where(cls_loss < 1e-5, 0.0, cls_loss)

    o_ref[...] = cls_loss.astype(o_ref.dtype)


def sigmoid_focal_loss(classification, targets, gamma=0.0, balance_weights=None):
    """classification/targets: [..., num_classes]; returns same shape."""
    if balance_weights is None:
        balance_weights = jnp.array([1.0], dtype=jnp.float32)

    orig_shape = classification.shape
    C = orig_shape[-1]
    total = math.prod(orig_shape)

    out_dtype = classification.dtype
    if not jnp.issubdtype(out_dtype, jnp.floating):
        out_dtype = jnp.float32

    # Lane-dense view width: multiple of 128 (full-lane vst) and of C
    # (balance-weight pattern phase-aligned on every row).
    L = (C * 128) // math.gcd(C, 128)        # lcm(C, 128)

    x_flat = classification.reshape(-1)      # free reshape (row-major)
    t_flat = targets.reshape(-1)
    pad = (-total) % L
    if pad:
        # Only hit when total element count isn't a multiple of lcm(C, 128);
        # padded outputs are sliced off below, so pad values are irrelevant.
        x_flat = jnp.pad(x_flat, (0, pad))
        t_flat = jnp.pad(t_flat, (0, pad))
    M = (total + pad) // L
    x2 = x_flat.reshape(M, L)
    t2 = t_flat.reshape(M, L)

    # Balance weights -> one [1, L] row (PyTorch trailing-dim broadcast).
    bw = jnp.asarray(balance_weights, dtype=jnp.float32).reshape(-1)
    bw = jnp.broadcast_to(bw, (C,))
    bw_row = jnp.tile(bw, L // C).reshape(1, L)

    # ~1 MiB of f32 per input tile (safe on v5e's 16 MiB scoped VMEM with
    # double buffering; near roofline on v6e/v7x).  Row axis = single grid
    # axis, ragged tail handled by Pallas (OOB writes dropped; elementwise).
    target_rows = max(8, ((1 << 20) // (L * 4)) // 8 * 8)
    block_rows = M if target_rows >= M else target_rows
    grid = (pl.cdiv(M, block_rows),)

    kernel = functools.partial(_focal_kernel, gamma=float(gamma))

    out2 = pl.pallas_call(
        kernel,
        out_shape=jax.ShapeDtypeStruct((M, L), out_dtype),
        grid_spec=pltpu.PrefetchScalarGridSpec(
            num_scalar_prefetch=0,
            grid=grid,
            in_specs=[
                pl.BlockSpec((block_rows, L), lambda i: (i, 0)),
                pl.BlockSpec((block_rows, L), lambda i: (i, 0)),
                pl.BlockSpec((1, L), lambda i: (0, 0)),
            ],
            out_specs=pl.BlockSpec((block_rows, L), lambda i: (i, 0)),
        ),
        compiler_params=pltpu.CompilerParams(
            dimension_semantics=("parallel",)),
    )(x2, t2, bw_row)

    out_flat = out2.reshape(-1)
    if pad:
        out_flat = out_flat[:total]
    return out_flat.reshape(orig_shape)


def _reference(classification, targets, gamma, balance_weights):
    # Pure-JAX mirror of the PyTorch module.
    probs = jax.nn.sigmoid(classification)
    fw = jnp.where(targets == 1.0, 1.0 - probs, probs) ** gamma
    bce = (-(targets * jax.nn.log_sigmoid(classification)) * balance_weights
           - (1.0 - targets) * jax.nn.log_sigmoid(-classification))
    loss = fw * bce
    loss = jnp.where(targets != -1.0, loss, 0.0)
    loss = jnp.where(loss < 1e-5, 0.0, loss)
    return loss


if __name__ == "__main__":
    key = jax.random.PRNGKey(0)
    k1, k2 = jax.random.split(key)

    # Small shapes: batch=2, spatial=16x16, num_classes=4 -> [..., C]
    B, H, W, C = 2, 16, 16, 4
    classification = jax.random.normal(k1, (B, H, W, C), dtype=jnp.float32) * 2.0
    targets = jax.random.randint(k2, (B, H, W, C), -1, 2).astype(jnp.float32)

    gamma = 2.0
    balance_weights = jnp.array([1.0, 2.0, 0.5, 1.5], dtype=jnp.float32)

    out = sigmoid_focal_loss(classification, targets, gamma, balance_weights)
    out = jax.block_until_ready(out)

    ref = _reference(classification, targets, gamma, balance_weights)
    assert out.shape == classification.shape
    # Slightly loose atol: values straddling the 1e-5 zeroing threshold can
    # legitimately differ by ~1e-5 between the fused and reference formulas.
    assert jnp.allclose(out, ref, atol=2e-5, rtol=1e-5), "mismatch vs reference"

    print("KERNEL_OK")
</pallas_src>

<mosaic_0001>
module attributes {stable_mosaic.version = 11 : i64} {
  func.func @_focal_kernel(%arg0: i32, %arg1: memref<16x128xf32, #tpu.memory_space<vmem>>, %arg2: memref<16x128xf32, #tpu.memory_space<vmem>>, %arg3: memref<1x128xf32, #tpu.memory_space<vmem>>, %arg4: memref<16x128xf32, #tpu.memory_space<vmem>>) attributes {dimension_semantics = [#tpu.dimension_semantics<parallel>], iteration_bounds = array<i64: 1>, scalar_prefetch = 0 : i64, scratch_operands = 0 : i64, tpu.core_type = #tpu.core_type<tc>, window_params = [{transform_indices = @transform_0, window_bounds = array<i64: 16, 128>}, {transform_indices = @transform_1, window_bounds = array<i64: 16, 128>}, {pipeline_mode = #tpu.pipeline_mode<synchronous>, transform_indices = @transform_2, window_bounds = array<i64: 1, 128>}, {transform_indices = @transform_3, window_bounds = array<i64: 16, 128>}]} {
    %c0 = arith.constant 0 : index
    %c0_0 = arith.constant 0 : index
    %0 = vector.load %arg1[%c0, %c0_0] : memref<16x128xf32, #tpu.memory_space<vmem>>, vector<16x128xf32>
    %c0_1 = arith.constant 0 : index
    %c0_2 = arith.constant 0 : index
    %1 = vector.load %arg2[%c0_1, %c0_2] : memref<16x128xf32, #tpu.memory_space<vmem>>, vector<16x128xf32>
    %c0_3 = arith.constant 0 : index
    %c0_4 = arith.constant 0 : index
    %2 = vector.load %arg3[%c0_3, %c0_4] : memref<1x128xf32, #tpu.memory_space<vmem>>, vector<1x128xf32>
    %3 = math.absf %0 : vector<16x128xf32>
    %cst = arith.constant 0.000000e+00 : f32
    %4 = vector.broadcast %cst : f32 to vector<16x128xf32>
    %5 = arith.subf %4, %3 : vector<16x128xf32>
    %6 = math.exp %5 : vector<16x128xf32>
    %7 = math.log1p %6 : vector<16x128xf32>
    %cst_5 = arith.constant 0.000000e+00 : f32
    %8 = vector.broadcast %cst_5 : f32 to vector<16x128xf32>
    %9 = arith.minimumf %0, %8 : vector<16x128xf32>
    %10 = arith.subf %9, %7 : vector<16x128xf32>
    %11 = arith.subf %10, %0 : vector<16x128xf32>
    %cst_6 = arith.constant 0.000000e+00 : f32
    %12 = vector.broadcast %cst_6 : f32 to vector<16x128xf32>
    %13 = arith.cmpf oge, %0, %12 : vector<16x128xf32>
    %cst_7 = arith.constant 1.000000e+00 : f32
    %14 = vector.broadcast %cst_7 : f32 to vector<16x128xf32>
    %15 = arith.select %13, %14, %6 : vector<16x128xi1>, vector<16x128xf32>
    %cst_8 = arith.constant 1.000000e+00 : f32
    %16 = vector.broadcast %cst_8 : f32 to vector<16x128xf32>
    %17 = arith.addf %16, %6 : vector<16x128xf32>
    %18 = arith.divf %15, %17 : vector<16x128xf32>
    %19 = arith.mulf %1, %10 : vector<16x128xf32>
    %cst_9 = arith.constant 0.000000e+00 : f32
    %20 = vector.broadcast %cst_9 : f32 to vector<16x128xf32>
    %21 = arith.subf %20, %19 : vector<16x128xf32>
    %22 = vector.broadcast %2 : vector<1x128xf32> to vector<16x128xf32>
    %23 = arith.mulf %21, %22 : vector<16x128xf32>
    %cst_10 = arith.constant 1.000000e+00 : f32
    %24 = vector.broadcast %cst_10 : f32 to vector<16x128xf32>
    %25 = arith.subf %24, %1 : vector<16x128xf32>
    %26 = arith.mulf %25, %11 : vector<16x128xf32>
    %27 = arith.subf %23, %26 : vector<16x128xf32>
    %cst_11 = arith.constant 1.000000e+00 : f32
    %28 = vector.broadcast %cst_11 : f32 to vector<16x128xf32>
    %29 = arith.cmpf oeq, %1, %28 : vector<16x128xf32>
    %cst_12 = arith.constant 1.000000e+00 : f32
    %30 = vector.broadcast %cst_12 : f32 to vector<16x128xf32>
    %31 = arith.subf %30, %18 : vector<16x128xf32>
    %32 = arith.select %29, %31, %18 : vector<16x128xi1>, vector<16x128xf32>
    %33 = arith.mulf %32, %32 : vector<16x128xf32>
    %34 = arith.mulf %33, %27 : vector<16x128xf32>
    %cst_13 = arith.constant -1.000000e+00 : f32
    %35 = vector.broadcast %cst_13 : f32 to vector<16x128xf32>
    %36 = arith.cmpf one, %1, %35 : vector<16x128xf32>
    %cst_14 = arith.constant 0.000000e+00 : f32
    %37 = vector.broadcast %cst_14 : f32 to vector<16x128xf32>
    %38 = arith.select %36, %34, %37 : vector<16x128xi1>, vector<16x128xf32>
    %cst_15 = arith.constant 9.99999974E-6 : f32
    %39 = vector.broadcast %cst_15 : f32 to vector<16x128xf32>
    %40 = arith.cmpf olt, %38, %39 : vector<16x128xf32>
    %cst_16 = arith.constant 0.000000e+00 : f32
    %41 = vector.broadcast %cst_16 : f32 to vector<16x128xf32>
    %42 = arith.select %40, %41, %38 : vector<16x128xi1>, vector<16x128xf32>
    %c0_17 = arith.constant 0 : index
    %c0_18 = arith.constant 0 : index
    %43 = vector.load %arg4[%c0_17, %c0_18] : memref<16x128xf32, #tpu.memory_space<vmem>>, vector<16x128xf32>
    tpu.vector_store %arg4[%c0_17, %c0_18], %42 {strides = array<i32>} : memref<16x128xf32, #tpu.memory_space<vmem>>, vector<16x128xf32>,
    return
  }
  func.func @transform_0(%arg0: i32) -> (i32, i32) {
    %c0_i32 = arith.constant 0 : i32
    %c0_i32_0 = arith.constant 0 : i32
    return %arg0, %c0_i32 : i32, i32
  }
  func.func @transform_1(%arg0: i32) -> (i32, i32) {
    %c0_i32 = arith.constant 0 : i32
    %c0_i32_0 = arith.constant 0 : i32
    return %arg0, %c0_i32 : i32, i32
  }
  func.func @transform_2(%arg0: i32) -> (i32, i32) {
    %c0_i32 = arith.constant 0 : i32
    %c0_i32_0 = arith.constant 0 : i32
    %c0_i32_1 = arith.constant 0 : i32
    return %c0_i32, %c0_i32_0 : i32, i32
  }
  func.func @transform_3(%arg0: i32) -> (i32, i32) {
    %c0_i32 = arith.constant 0 : i32
    %c0_i32_0 = arith.constant 0 : i32
    return %arg0, %c0_i32 : i32, i32
  }
}

</mosaic_0001>

<bundles_post_ra>
// kernel: tpu_custom_call.1
= control target key start
LH: loop header
LB: loop body
LE: loop exit
PB: predicated region body
PF: predicated region fallthrough
CT: control target
= control target key end

     0   :  { %8 = vsyncpa [#allocation3], 0  ;;  %s315_s0 = inlined_call_operand.hbm [shape: f32[16,128], index: 0, kind: input, shape index: {}]   ;;  %s316_s1 = inlined_call_operand.hbm [shape: f32[16,128], index: 1, kind: input, shape index: {}]   ;;  %s317_s2 = inlined_call_operand.vmem [shape: f32[1,128], index: 2, kind: input, shape index: {}]   ;;  %s318_s3 = inlined_call_operand.hbm [shape: f32[16,128], index: 3, kind: output, shape index: {}]  }
   0x1   :  { %9 = vsyncpa [#allocation6], 0 }
   0x2   :  { %10 = vsyncpa [#allocation4], 0  ;;  %s236_s12 = smov [#allocation2]   ;;  %s164_s16 = scalar_lea.hbm %s315_s0, 256 }
   0x3   :  { %s16_s13 = sshll.u32 %s236_s12, 4  ;;  %p165_p0 = scmp.ne.s32.totalorder %s315_s0, %s164_s16  ;;  %s17_s13 = int_to_ptr.vmem [resolvable:$true] %s16_s13 }
   0x4   :  { %p168_p1 = scmp.lt.u32.totalorder %s164_s16, %s315_s0 }
   0x6   :  { %p170_p2 = pnand %p168_p1, %p165_p0 }
   0x8   :  { %173 = shalt.err (!%p170_p2)
}
   0x9   :  { %s174_s21 = scalar_lea.vmem %s17_s13, 256  ;;  %p179_p4 = scmp.lt.s32.totalorder %s17_s13, %s17_s13 }
   0xa   :  { %p175_p3 = scmp.ne.s32.totalorder %s17_s13, %s174_s21  ;;  %p180_p5 = scmp.lt.s32.totalorder %s174_s21, %s174_s21 }
   0xc   :  { %p181_p6 = por %p180_p5, %p179_p4 }
   0xe   :  { %p182_p7 = pnand %p181_p6, %p175_p3 }
  0x10   :  { %185 = shalt.err (!%p182_p7)
}
  0x11   :  { %s237_s22 = smov 128   ;;  %s238_s23 = smov 8  }
  0x12   :  { %22 = dma.hbm_to_vmem [thread:$0]  %s315_s0, 256, %s17_s13, [#allocation3], %s237_s22, %s237_s22, %s238_s23  }
  0x13   :  { %s239_s26 = smov [#allocation5]   ;;  %s186_s30 = scalar_lea.hbm %s316_s1, 256 }
  0x14   :  { %s28_s27 = sshll.u32 %s239_s26, 4  ;;  %p187_p8 = scmp.ne.s32.totalorder %s316_s1, %s186_s30  ;;  %s29_s27 = int_to_ptr.vmem [resolvable:$true] %s28_s27 }
  0x15   :  { %p190_p9 = scmp.lt.u32.totalorder %s186_s30, %s316_s1 }
  0x17   :  { %p192_p10 = pnand %p190_p9, %p187_p8 }
  0x19   :  { %195 = shalt.err (!%p192_p10)
}
  0x1a   :  { %s196_s8 = scalar_lea.vmem %s29_s27, 256  ;;  %p201_p12 = scmp.lt.s32.totalorder %s29_s27, %s29_s27 }
  0x1b   :  { %p197_p11 = scmp.ne.s32.totalorder %s29_s27, %s196_s8  ;;  %p202_p13 = scmp.lt.s32.totalorder %s196_s8, %s196_s8 }
  0x1d   :  { %p203_p0 = por %p202_p13, %p201_p12 }
  0x1f   :  { %p204_p1 = pnand %p203_p0, %p197_p11 }
  0x21   :  { %207 = shalt.err (!%p204_p1)
}
  0x22   :  { %34 = dma.hbm_to_vmem [thread:$0]  %s316_s1, 256, %s29_s27, [#allocation6], %s237_s22, %s237_s22, %s238_s23  }
  0x23   :  { %230 = dma.done.wait [#allocation3], 256  }
  0x24   :  { %231 = vsyncadd [#allocation3], 4294967040 }
  0x25   :  { %232 = dma.done.wait [#allocation6], 256  }
  0x26   :  { %233 = vsyncadd [#allocation6], 4294967040  ;;  %v43_v0 = vld [vmem:[#allocation2] sm:$0xff]  ;;  %v291_v2 = vld [vmem:[#allocation2 + $0x8] sm:$0xff] }
  0x27   :  { %v48_v1 = vand.u32 2147483647, %v43_v0  ;;  %v49_v3 = vand.u32 2147483647, %v291_v2  ;;  %vm80_vm0 = vcmp.ge.f32.partialorder %v43_v0, 0.0  ;;  %vm81_vm1 = vcmp.ge.f32.partialorder %v291_v2, 0.0 }
  0x28   :  { %v74_v21 = vmin.f32 %v43_v0, 0.0  ;;  %v45_v27 = vld [vmem:[#allocation5] sm:$0xff]  ;;  %v75_v29 = vmin.f32 %v291_v2, 0.0  ;;  %v46_v36 = vld [vmem:[#allocation5 + $0x8] sm:$0xff]  ;;  %v146_v43 = vld [vmem:[%s317_s2] ss:$0 sm:$0xff] }
  0x29   :  { %v50_v4 = vsub.f32 0.0, %v48_v1  ;;  %v51_v5 = vsub.f32 0.0, %v49_v3  ;;  %v102_v32 = vsub.f32 1.0, %v45_v27  ;;  %vm108_vm4 = vcmp.eq.f32.partialorder %v45_v27, 1.0  ;;  %s240_s2 = smov [#allocation7]  }
  0x2a   :  { %v103_v39 = vsub.f32 1.0, %v46_v36  ;;  %vm109_vm5 = vcmp.eq.f32.partialorder %v46_v36, 1.0  ;;  %vm118_vm6 = vcmp.ne.f32.partialorder %v45_v27, -1.0  ;;  %vm119_vm7 = vcmp.ne.f32.partialorder %v46_v36, -1.0  ;;  %s133_s11 = sshll.u32 %s240_s2, 4  ;;  %s134_s11 = int_to_ptr.vmem [resolvable:$true] %s133_s11 }
  0x2b   :  { %v52_v6 = vmul.f32 1.442695, %v50_v4  ;;  %v54_v7 = vmul.f32 1.442695, %v51_v5  ;;  %s208_s12 = scalar_lea.vmem %s134_s11, 256  ;;  %p213_p3 = scmp.lt.s32.totalorder %s134_s11, %s134_s11 }
  0x2c   :  { %p209_p2 = scmp.ne.s32.totalorder %s134_s11, %s208_s12  ;;  %p214_p4 = scmp.lt.s32.totalorder %s208_s12, %s208_s12 }
  0x2d   :  { %152 = vpow2.f32 %v52_v6 }
  0x2e   :  { %154 = vpow2.f32 %v54_v7  ;;  %p215_p5 = por %p214_p4, %p213_p3 }
  0x30   :  { %p216_p6 = pnand %p215_p5, %p209_p2 }
  0x37   :  { %v153_v8 = vpop.eup %152 }
  0x38   :  { %v155_v9 = vpop.eup %154  ;;  %v56_v10 = vadd.f32 1.0, %v153_v8  ;;  %v59_v12 = vmul.f32 -0.5, %v153_v8  ;;  %v62_v15 = vand.u32 2147483647, %v153_v8  ;;  %v82_v19 = vsel %vm80_vm0, 1.0, %v153_v8 }
  0x39   :  { %v65_v11 = vadd.f32 1.0, %v155_v9  ;;  %v68_v13 = vmul.f32 -0.5, %v155_v9  ;;  %v71_v17 = vand.u32 2147483647, %v155_v9  ;;  %v83_v25 = vsel %vm81_vm1, 1.0, %v155_v9 }
  0x3a   :  { %156 = vlog2.f32 %v56_v10  ;;  %v60_v14 = vadd.f32 1.0, %v59_v12  ;;  %vm63_vm2 = vcmp.lt.f32.partialorder %v62_v15, 0.0004427343 }
  0x3b   :  { %158 = vrcp.f32 %v56_v10  ;;  %v69_v16 = vadd.f32 1.0, %v68_v13  ;;  %vm72_vm3 = vcmp.lt.f32.partialorder %v71_v17, 0.0004427343 }
  0x3c   :  { %160 = vlog2.f32 %v65_v11  ;;  %v61_v18 = vmul.f32 %v153_v8, %v60_v14 }
  0x3d   :  { %162 = vrcp.f32 %v65_v11  ;;  %v70_v24 = vmul.f32 %v155_v9, %v69_v16 }
  0x44   :  { %v157_v20 = vpop.eup %156 }
  0x45   :  { %v159_v22 = vpop.eup %158  ;;  %v58_v23 = vmul.f32 0.6931472, %v157_v20 }
  0x46   :  { %v161_v26 = vpop.eup %160  ;;  %v87_v28 = vmul.f32 %v159_v22, %v82_v19 }
  0x47   :  { %v163_v30 = vpop.eup %162  ;;  %v64_v31 = vsel %vm63_vm2, %v61_v18, %v58_v23  ;;  %v67_v33 = vmul.f32 0.6931472, %v161_v26 }
  0x48   :  { %v76_v34 = vsub.f32 %v74_v21, %v64_v31  ;;  %v110_v35 = vsub.f32 1.0, %v87_v28  ;;  %v89_v37 = vmul.f32 %v163_v30, %v83_v25 }
  0x49   :  { %v73_v38 = vsel %vm72_vm3, %v70_v24, %v67_v33 }
  0x4a   :  { %v78_v40 = vsub.f32 %v76_v34, %v43_v0  ;;  %v90_v41 = vmul.f32 %v76_v34, %v45_v27  ;;  %v77_v42 = vsub.f32 %v75_v29, %v73_v38  ;;  %v112_v44 = vsel %vm108_vm4, %v110_v35, %v87_v28 }
  0x4b   :  { %v111_v45 = vsub.f32 1.0, %v89_v37  ;;  %v114_v52 = vmul.f32 %v112_v44, %v112_v44 }
  0x4c   :  { %v92_v46 = vsub.f32 0.0, %v90_v41  ;;  %v104_v47 = vmul.f32 %v102_v32, %v78_v40  ;;  %v79_v48 = vsub.f32 %v77_v42, %v291_v2  ;;  %v91_v49 = vmul.f32 %v77_v42, %v46_v36 }
  0x4d   :  { %v113_v50 = vsel %vm109_vm5, %v111_v45, %v89_v37 }
  0x4e   :  { %v100_v51 = vmul.f32 %v146_v43, %v92_v46  ;;  %v93_v53 = vsub.f32 0.0, %v91_v49  ;;  %v105_v54 = vmul.f32 %v103_v39, %v79_v48  ;;  %v115_v57 = vmul.f32 %v113_v50, %v113_v50 }
  0x50   :  { %v106_v55 = vsub.f32 %v100_v51, %v104_v47  ;;  %v101_v56 = vmul.f32 %v146_v43, %v93_v53 }
  0x52   :  { %v116_v58 = vmul.f32 %v114_v52, %v106_v55  ;;  %v107_v59 = vsub.f32 %v101_v56, %v105_v54 }
  0x54   :  { %v120_v60 = vsel %vm118_vm6, %v116_v58, 0.0  ;;  %v117_v61 = vmul.f32 %v115_v57, %v107_v59 }
  0x55   :  { %vm122_vm8 = vcmp.lt.f32.partialorder %v120_v60, 1e-05 }
  0x56   :  { %v124_v62 = vsel %vm122_vm8, 0.0, %v120_v60  ;;  %v121_v63 = vsel %vm119_vm7, %v117_v61, 0.0 }
  0x57   :  { %126 = vst [vmem:[#allocation7] sm:$0xff] %v124_v62  ;;  %vm123_vm9 = vcmp.lt.f32.partialorder %v121_v63, 1e-05 }
  0x58   :  { %v125_v0 = vsel %vm123_vm9, 0.0, %v121_v63 }
  0x59   :  { %127 = vst [vmem:[#allocation7 + $0x8] sm:$0xff] %v125_v0 }
  0x5a   :  { %219 = shalt.err (!%p216_p6)
}
  0x5b   :  { %s220_s15 = scalar_lea.hbm %s318_s3, 256 }
  0x5c   :  { %p221_p7 = scmp.ne.s32.totalorder %s318_s3, %s220_s15  ;;  %p224_p8 = scmp.lt.u32.totalorder %s220_s15, %s318_s3 }
  0x5e   :  { %p226_p9 = pnand %p224_p8, %p221_p7 }
  0x60   :  { %229 = shalt.err (!%p226_p9)
}
  0x61   :  { %139 = dma.vmem_to_hbm [thread:$0]  %s134_s11, 256, %s318_s3, [#allocation4], %s237_s22, %s237_s22, %s238_s23  }
  0x62   :  { %234 = dma.done.wait [#allocation4], 256  }
  0x63   :  { %235 = vsyncadd [#allocation4], 4294967040 }
  0x64   :  { %143 = vsyncpa [#allocation3], 1 }
  0x65   :  { %144 = vsyncpa [#allocation6], 1 }
  0x66   :  { %145 = vsyncpa [#allocation4], 1 }

</bundles_post_ra>
